<compile_context>
chip_gen: v7x
topology: tpu7x:2x2x1
jax: 0.10.0
libtpu: 0.0.40
codegen_flags: <defaults>
</compile_context>

<pallas_src>
import functools

import jax
import jax.numpy as jnp
import numpy as np
from jax import lax
from jax.experimental import pallas as pl
from jax.experimental.pallas import tpu as pltpu


def separable_conv2d_pallas(x_nchw, w_dw, bn_gamma, bn_beta, bn_mean, bn_var,
                            w_pw, *, padding=1, eps=1e-5):
    """Fused depthwise conv + BN (eval) + ReLU + pointwise conv (stride=1, dil=1)."""
    N, Cin, H, W = x_nchw.shape
    KH, KW = int(w_dw.shape[2]), int(w_dw.shape[3])
    assert KH == KW, "square depthwise kernel expected"
    K = KH
    assert 2 * padding == K - 1, "kernel assumes 'same' padding with stride 1"
    Cout = int(w_pw.shape[0])
    HW = H * W
    pad_amt = padding
    halo = pad_amt * (W + 1)                       # flat-index reach of all taps
    halo_alloc = ((halo + 127) // 128) * 128 if halo > 0 else 0   # lane-aligned halo

    # ---- parameter folding + free reshapes (no HBM round trip of x) ----
    inv_std = bn_gamma / jnp.sqrt(bn_var + eps)
    wdw = (w_dw[:, 0, :, :] * inv_std[:, None, None]).reshape(Cin, K * K)  # BN scale folded
    bias = (bn_beta - bn_mean * inv_std).reshape(Cin, 1)                   # BN bias
    wpw = w_pw[:, :, 0, 0]                                                 # (Cout, Cin)
    x_flat = x_nchw.reshape(N, Cin, HW)                                    # free reshape

    def kernel(x_ref, wdw_ref, b_ref, wpw_ref, o_ref, pad_ref):
        # Stage the image into a zero-haloed flat scratch (covers top/bottom pad).
        if halo_alloc > 0:
            zeros_halo = jnp.zeros((Cin, halo_alloc), jnp.float32)
            pad_ref[:, 0:halo_alloc] = zeros_halo
            pad_ref[:, halo_alloc + HW:halo_alloc + HW + halo_alloc] = zeros_halo
        pad_ref[:, halo_alloc:halo_alloc + HW] = x_ref[0].astype(jnp.float32)

        wk = wdw_ref[...].astype(jnp.float32)      # (Cin, K*K), BN scale already folded

        # Masks that kill horizontal taps wrapping across row boundaries.
        keep = {}
        if K > 1:
            col = lax.broadcasted_iota(jnp.int32, (Cin, HW), 1) % W
            for kw in range(K):
                dw = kw - pad_amt
                if dw != 0:
                    keep[kw] = jnp.logical_and(col >= -dw, col < W - dw)

        # Depthwise conv: K*K shifted ref-slice loads + per-channel MACs on the VPU.
        acc = None
        for kh in range(K):
            dh = kh - pad_amt
            for kw in range(K):
                dw = kw - pad_amt
                start = halo_alloc + dh * W + dw
                t = pad_ref[:, start:start + HW]            # (Cin, HW) slice load
                if dw != 0:
                    t = jnp.where(keep[kw], t, 0.0)
                term = t * wk[:, kh * K + kw:kh * K + kw + 1]
                acc = term if acc is None else acc + term   # first tap initializes acc

        # Fused BatchNorm bias + ReLU.
        y = jnp.maximum(acc + b_ref[...], 0.0)              # (Cin, HW)

        # Pointwise 1x1 conv as Cin broadcast-MAC outer products on the VPU
        # (exact f32; MXU dot is better once Cin is large — see TODO above).
        wp = wpw_ref[...].astype(jnp.float32)               # (Cout, Cin)
        out = None
        for c in range(Cin):
            contrib = wp[:, c:c + 1] * y[c:c + 1, :]        # (Cout,1)*(1,HW) -> (Cout,HW)
            out = contrib if out is None else out + contrib

        o_ref[0] = out.astype(o_ref.dtype)                  # lane-dense (Cout, HW) store

    out_flat = pl.pallas_call(
        kernel,
        out_shape=jax.ShapeDtypeStruct((N, Cout, HW), x_nchw.dtype),
        grid=(N,),
        in_specs=[
            pl.BlockSpec((1, Cin, HW), lambda n: (n, 0, 0)),
            pl.BlockSpec((Cin, K * K), lambda n: (0, 0)),
            pl.BlockSpec((Cin, 1), lambda n: (0, 0)),
            pl.BlockSpec((Cout, Cin), lambda n: (0, 0)),
        ],
        out_specs=pl.BlockSpec((1, Cout, HW), lambda n: (n, 0, 0)),
        scratch_shapes=[pltpu.VMEM((Cin, HW + 2 * halo_alloc), jnp.float32)],
        compiler_params=pltpu.CompilerParams(
            dimension_semantics=("parallel",)),
    )(x_flat, wdw, bias, wpw)

    return out_flat.reshape(N, Cout, H, W)                  # free reshape back to NCHW


def separable_conv2d_ref(x, w_dw, g, b, m, v, w_pw, *, padding=1, eps=1e-5):
    """Pure-JAX reference mirroring the PyTorch module (eval-mode BN)."""
    Cin = x.shape[1]
    dn = ('NCHW', 'OIHW', 'NCHW')
    y = lax.conv_general_dilated(x, w_dw, (1, 1),
                                 ((padding, padding), (padding, padding)),
                                 feature_group_count=Cin, dimension_numbers=dn,
                                 precision=lax.Precision.HIGHEST)
    y = (y - m[None, :, None, None]) / jnp.sqrt(v[None, :, None, None] + eps)
    y = y * g[None, :, None, None] + b[None, :, None, None]
    y = jnp.maximum(y, 0.0)
    return lax.conv_general_dilated(y, w_pw, (1, 1), ((0, 0), (0, 0)),
                                    dimension_numbers=dn,
                                    precision=lax.Precision.HIGHEST)


if __name__ == "__main__":
    # module config: SeparableConv2d(in_channels=8, out_channels=16,
    #                                kernel_size=3, stride=1, padding=1, bias=False)
    N, Cin, Cout, H, W, K = 2, 8, 16, 16, 16, 3

    key = jax.random.PRNGKey(0)
    k0, k1, k2, k3, k4 = jax.random.split(key, 5)
    x = jax.random.normal(k0, (N, Cin, H, W), jnp.float32)
    w_dw = jax.random.normal(k1, (Cin, 1, K, K), jnp.float32) * 0.2     # depthwise weight
    w_pw = jax.random.normal(k2, (Cout, Cin, 1, 1), jnp.float32) * 0.2  # pointwise weight
    bn_gamma = 1.0 + 0.1 * jax.random.normal(k3, (Cin,), jnp.float32)
    bn_beta = 0.1 * jax.random.normal(k4, (Cin,), jnp.float32)
    bn_mean = jnp.zeros((Cin,), jnp.float32)   # torch BatchNorm2d default running stats
    bn_var = jnp.ones((Cin,), jnp.float32)

    run = jax.jit(functools.partial(separable_conv2d_pallas, padding=1))
    out = run(x, w_dw, bn_gamma, bn_beta, bn_mean, bn_var, w_pw)
    out = jax.block_until_ready(out)

    ref = separable_conv2d_ref(x, w_dw, bn_gamma, bn_beta, bn_mean, bn_var,
                               w_pw, padding=1)
    np.testing.assert_allclose(np.asarray(out), np.asarray(ref),
                               rtol=1e-4, atol=1e-4)
    print("KERNEL_OK")
</pallas_src>

<mosaic_0001>
module attributes {stable_mosaic.version = 11 : i64} {
  func.func @kernel(%arg0: i32, %arg1: memref<1x8x256xf32, #tpu.memory_space<vmem>>, %arg2: memref<8x9xf32, #tpu.memory_space<vmem>>, %arg3: memref<8x1xf32, #tpu.memory_space<vmem>>, %arg4: memref<16x8xf32, #tpu.memory_space<vmem>>, %arg5: memref<1x16x256xf32, #tpu.memory_space<vmem>>, %arg6: memref<8x512xf32, #tpu.memory_space<vmem>>) attributes {dimension_semantics = [#tpu.dimension_semantics<parallel>], iteration_bounds = array<i64: 2>, scalar_prefetch = 0 : i64, scratch_operands = 1 : i64, tpu.core_type = #tpu.core_type<tc>, window_params = [{transform_indices = @transform_0, window_bounds = array<i64: 1, 8, 256>}, {pipeline_mode = #tpu.pipeline_mode<synchronous>, transform_indices = @transform_1, window_bounds = array<i64: 8, 9>}, {pipeline_mode = #tpu.pipeline_mode<synchronous>, transform_indices = @transform_2, window_bounds = array<i64: 8, 1>}, {pipeline_mode = #tpu.pipeline_mode<synchronous>, transform_indices = @transform_3, window_bounds = array<i64: 16, 8>}, {transform_indices = @transform_4, window_bounds = array<i64: 1, 16, 256>}]} {
    %cst = arith.constant 0.000000e+00 : f32
    %0 = vector.broadcast %cst : f32 to vector<8x128xf32>
    %c0 = arith.constant 0 : index
    %c0_0 = arith.constant 0 : index
    %1 = vector.load %arg6[%c0, %c0_0] : memref<8x512xf32, #tpu.memory_space<vmem>>, vector<8x128xf32>
    tpu.vector_store %arg6[%c0, %c0_0], %0 {strides = array<i32>} : memref<8x512xf32, #tpu.memory_space<vmem>>, vector<8x128xf32>,
    %c0_1 = arith.constant 0 : index
    %c384 = arith.constant 384 : index
    %2 = vector.load %arg6[%c0_1, %c384] : memref<8x512xf32, #tpu.memory_space<vmem>>, vector<8x128xf32>
    tpu.vector_store %arg6[%c0_1, %c384], %0 {strides = array<i32>} : memref<8x512xf32, #tpu.memory_space<vmem>>, vector<8x128xf32>,
    %c0_2 = arith.constant 0 : index
    %c0_3 = arith.constant 0 : index
    %c0_4 = arith.constant 0 : index
    %3 = vector.load %arg1[%c0_2, %c0_3, %c0_4] : memref<1x8x256xf32, #tpu.memory_space<vmem>>, vector<1x8x256xf32>
    %4 = vector.shape_cast %3 : vector<1x8x256xf32> to vector<8x256xf32>
    %c0_5 = arith.constant 0 : index
    %c128 = arith.constant 128 : index
    %5 = vector.load %arg6[%c0_5, %c128] : memref<8x512xf32, #tpu.memory_space<vmem>>, vector<8x256xf32>
    tpu.vector_store %arg6[%c0_5, %c128], %4 {strides = array<i32>} : memref<8x512xf32, #tpu.memory_space<vmem>>, vector<8x256xf32>,
    %c0_6 = arith.constant 0 : index
    %c0_7 = arith.constant 0 : index
    %6 = vector.load %arg2[%c0_6, %c0_7] : memref<8x9xf32, #tpu.memory_space<vmem>>, vector<8x9xf32>
    %7 = tpu.iota {dimensions = array<i32: 1>} : vector<8x256xi32>
    %c16_i32 = arith.constant 16 : i32
    %c0_i32 = arith.constant 0 : i32
    %8 = arith.cmpi eq, %c16_i32, %c0_i32 : i32
    %c1_i32 = arith.constant 1 : i32
    %9 = arith.select %8, %c1_i32, %c16_i32 : i32
    %10 = vector.broadcast %9 : i32 to vector<8x256xi32>
    %11 = arith.remsi %7, %10 : vector<8x256xi32>
    %c0_i32_8 = arith.constant 0 : i32
    %12 = vector.broadcast %c0_i32_8 : i32 to vector<8x256xi32>
    %13 = arith.cmpi ne, %11, %12 : vector<8x256xi32>
    %c0_i32_9 = arith.constant 0 : i32
    %14 = vector.broadcast %c0_i32_9 : i32 to vector<8x256xi32>
    %15 = arith.cmpi slt, %11, %14 : vector<8x256xi32>
    %c0_i32_10 = arith.constant 0 : i32
    %16 = arith.cmpi slt, %9, %c0_i32_10 : i32
    %17 = vector.broadcast %16 : i1 to vector<8x256xi1>
    %18 = vector.broadcast %17 : vector<8x256xi1> to vector<8x256xi1>
    %19 = arith.xori %15, %18 : vector<8x256xi1>
    %20 = arith.andi %19, %13 : vector<8x256xi1>
    %21 = vector.broadcast %9 : i32 to vector<8x256xi32>
    %22 = arith.addi %11, %21 : vector<8x256xi32>
    %23 = arith.select %20, %22, %11 : vector<8x256xi1>, vector<8x256xi32>
    %c1_i32_11 = arith.constant 1 : i32
    %24 = vector.broadcast %c1_i32_11 : i32 to vector<8x256xi32>
    %25 = arith.cmpi sge, %23, %24 : vector<8x256xi32>
    %c17_i32 = arith.constant 17 : i32
    %26 = vector.broadcast %c17_i32 : i32 to vector<8x256xi32>
    %27 = arith.cmpi slt, %23, %26 : vector<8x256xi32>
    %28 = arith.andi %25, %27 : vector<8x256xi1>
    %c-1_i32 = arith.constant -1 : i32
    %29 = vector.broadcast %c-1_i32 : i32 to vector<8x256xi32>
    %30 = arith.cmpi sge, %23, %29 : vector<8x256xi32>
    %c15_i32 = arith.constant 15 : i32
    %31 = vector.broadcast %c15_i32 : i32 to vector<8x256xi32>
    %32 = arith.cmpi slt, %23, %31 : vector<8x256xi32>
    %33 = arith.andi %30, %32 : vector<8x256xi1>
    %c0_12 = arith.constant 0 : index
    %c111 = arith.constant 111 : index
    %34 = vector.load %arg6[%c0_12, %c111] : memref<8x512xf32, #tpu.memory_space<vmem>>, vector<8x256xf32>
    %cst_13 = arith.constant 0.000000e+00 : f32
    %35 = vector.broadcast %cst_13 : f32 to vector<8x256xf32>
    %36 = arith.select %28, %34, %35 : vector<8x256xi1>, vector<8x256xf32>
    %37 = vector.extract_strided_slice %6 {offsets = [0, 0], sizes = [8, 1], strides = [1, 1]} : vector<8x9xf32> to vector<8x1xf32>
    %38 = vector.broadcast %37 : vector<8x1xf32> to vector<8x256xf32>
    %39 = arith.mulf %36, %38 : vector<8x256xf32>
    %c0_14 = arith.constant 0 : index
    %c112 = arith.constant 112 : index
    %40 = vector.load %arg6[%c0_14, %c112] : memref<8x512xf32, #tpu.memory_space<vmem>>, vector<8x256xf32>
    %41 = vector.extract_strided_slice %6 {offsets = [0, 1], sizes = [8, 1], strides = [1, 1]} : vector<8x9xf32> to vector<8x1xf32>
    %42 = vector.broadcast %41 : vector<8x1xf32> to vector<8x256xf32>
    %43 = arith.mulf %40, %42 : vector<8x256xf32>
    %44 = arith.addf %39, %43 : vector<8x256xf32>
    %c0_15 = arith.constant 0 : index
    %c113 = arith.constant 113 : index
    %45 = vector.load %arg6[%c0_15, %c113] : memref<8x512xf32, #tpu.memory_space<vmem>>, vector<8x256xf32>
    %cst_16 = arith.constant 0.000000e+00 : f32
    %46 = vector.broadcast %cst_16 : f32 to vector<8x256xf32>
    %47 = arith.select %33, %45, %46 : vector<8x256xi1>, vector<8x256xf32>
    %48 = vector.extract_strided_slice %6 {offsets = [0, 2], sizes = [8, 1], strides = [1, 1]} : vector<8x9xf32> to vector<8x1xf32>
    %49 = vector.broadcast %48 : vector<8x1xf32> to vector<8x256xf32>
    %50 = arith.mulf %47, %49 : vector<8x256xf32>
    %51 = arith.addf %44, %50 : vector<8x256xf32>
    %c0_17 = arith.constant 0 : index
    %c127 = arith.constant 127 : index
    %52 = vector.load %arg6[%c0_17, %c127] : memref<8x512xf32, #tpu.memory_space<vmem>>, vector<8x256xf32>
    %cst_18 = arith.constant 0.000000e+00 : f32
    %53 = vector.broadcast %cst_18 : f32 to vector<8x256xf32>
    %54 = arith.select %28, %52, %53 : vector<8x256xi1>, vector<8x256xf32>
    %55 = vector.extract_strided_slice %6 {offsets = [0, 3], sizes = [8, 1], strides = [1, 1]} : vector<8x9xf32> to vector<8x1xf32>
    %56 = vector.broadcast %55 : vector<8x1xf32> to vector<8x256xf32>
    %57 = arith.mulf %54, %56 : vector<8x256xf32>
    %58 = arith.addf %51, %57 : vector<8x256xf32>
    %c0_19 = arith.constant 0 : index
    %c128_20 = arith.constant 128 : index
    %59 = vector.load %arg6[%c0_19, %c128_20] : memref<8x512xf32, #tpu.memory_space<vmem>>, vector<8x256xf32>
    %60 = vector.extract_strided_slice %6 {offsets = [0, 4], sizes = [8, 1], strides = [1, 1]} : vector<8x9xf32> to vector<8x1xf32>
    %61 = vector.broadcast %60 : vector<8x1xf32> to vector<8x256xf32>
    %62 = arith.mulf %59, %61 : vector<8x256xf32>
    %63 = arith.addf %58, %62 : vector<8x256xf32>
    %c0_21 = arith.constant 0 : index
    %c129 = arith.constant 129 : index
    %64 = vector.load %arg6[%c0_21, %c129] : memref<8x512xf32, #tpu.memory_space<vmem>>, vector<8x256xf32>
    %cst_22 = arith.constant 0.000000e+00 : f32
    %65 = vector.broadcast %cst_22 : f32 to vector<8x256xf32>
    %66 = arith.select %33, %64, %65 : vector<8x256xi1>, vector<8x256xf32>
    %67 = vector.extract_strided_slice %6 {offsets = [0, 5], sizes = [8, 1], strides = [1, 1]} : vector<8x9xf32> to vector<8x1xf32>
    %68 = vector.broadcast %67 : vector<8x1xf32> to vector<8x256xf32>
    %69 = arith.mulf %66, %68 : vector<8x256xf32>
    %70 = arith.addf %63, %69 : vector<8x256xf32>
    %c0_23 = arith.constant 0 : index
    %c143 = arith.constant 143 : index
    %71 = vector.load %arg6[%c0_23, %c143] : memref<8x512xf32, #tpu.memory_space<vmem>>, vector<8x256xf32>
    %cst_24 = arith.constant 0.000000e+00 : f32
    %72 = vector.broadcast %cst_24 : f32 to vector<8x256xf32>
    %73 = arith.select %28, %71, %72 : vector<8x256xi1>, vector<8x256xf32>
    %74 = vector.extract_strided_slice %6 {offsets = [0, 6], sizes = [8, 1], strides = [1, 1]} : vector<8x9xf32> to vector<8x1xf32>
    %75 = vector.broadcast %74 : vector<8x1xf32> to vector<8x256xf32>
    %76 = arith.mulf %73, %75 : vector<8x256xf32>
    %77 = arith.addf %70, %76 : vector<8x256xf32>
    %c0_25 = arith.constant 0 : index
    %c144 = arith.constant 144 : index
    %78 = vector.load %arg6[%c0_25, %c144] : memref<8x512xf32, #tpu.memory_space<vmem>>, vector<8x256xf32>
    %79 = vector.extract_strided_slice %6 {offsets = [0, 7], sizes = [8, 1], strides = [1, 1]} : vector<8x9xf32> to vector<8x1xf32>
    %80 = vector.broadcast %79 : vector<8x1xf32> to vector<8x256xf32>
    %81 = arith.mulf %78, %80 : vector<8x256xf32>
    %82 = arith.addf %77, %81 : vector<8x256xf32>
    %c0_26 = arith.constant 0 : index
    %c145 = arith.constant 145 : index
    %83 = vector.load %arg6[%c0_26, %c145] : memref<8x512xf32, #tpu.memory_space<vmem>>, vector<8x256xf32>
    %cst_27 = arith.constant 0.000000e+00 : f32
    %84 = vector.broadcast %cst_27 : f32 to vector<8x256xf32>
    %85 = arith.select %33, %83, %84 : vector<8x256xi1>, vector<8x256xf32>
    %86 = vector.extract_strided_slice %6 {offsets = [0, 8], sizes = [8, 1], strides = [1, 1]} : vector<8x9xf32> to vector<8x1xf32>
    %87 = vector.broadcast %86 : vector<8x1xf32> to vector<8x256xf32>
    %88 = arith.mulf %85, %87 : vector<8x256xf32>
    %89 = arith.addf %82, %88 : vector<8x256xf32>
    %c0_28 = arith.constant 0 : index
    %c0_29 = arith.constant 0 : index
    %90 = vector.load %arg3[%c0_28, %c0_29] : memref<8x1xf32, #tpu.memory_space<vmem>>, vector<8x1xf32>
    %91 = vector.broadcast %90 : vector<8x1xf32> to vector<8x256xf32>
    %92 = arith.addf %89, %91 : vector<8x256xf32>
    %cst_30 = arith.constant 0.000000e+00 : f32
    %93 = vector.broadcast %cst_30 : f32 to vector<8x256xf32>
    %94 = arith.maximumf %92, %93 : vector<8x256xf32>
    %c0_31 = arith.constant 0 : index
    %c0_32 = arith.constant 0 : index
    %95 = vector.load %arg4[%c0_31, %c0_32] : memref<16x8xf32, #tpu.memory_space<vmem>>, vector<16x8xf32>
    %96 = vector.extract_strided_slice %95 {offsets = [0, 0], sizes = [16, 1], strides = [1, 1]} : vector<16x8xf32> to vector<16x1xf32>
    %97 = vector.extract_strided_slice %94 {offsets = [0, 0], sizes = [1, 256], strides = [1, 1]} : vector<8x256xf32> to vector<1x256xf32>
    %98 = vector.broadcast %96 : vector<16x1xf32> to vector<16x256xf32>
    %99 = vector.broadcast %97 : vector<1x256xf32> to vector<16x256xf32>
    %100 = arith.mulf %98, %99 : vector<16x256xf32>
    %101 = vector.extract_strided_slice %95 {offsets = [0, 1], sizes = [16, 1], strides = [1, 1]} : vector<16x8xf32> to vector<16x1xf32>
    %102 = vector.extract_strided_slice %94 {offsets = [1, 0], sizes = [1, 256], strides = [1, 1]} : vector<8x256xf32> to vector<1x256xf32>
    %103 = vector.broadcast %101 : vector<16x1xf32> to vector<16x256xf32>
    %104 = vector.broadcast %102 : vector<1x256xf32> to vector<16x256xf32>
    %105 = arith.mulf %103, %104 : vector<16x256xf32>
    %106 = arith.addf %100, %105 : vector<16x256xf32>
    %107 = vector.extract_strided_slice %95 {offsets = [0, 2], sizes = [16, 1], strides = [1, 1]} : vector<16x8xf32> to vector<16x1xf32>
    %108 = vector.extract_strided_slice %94 {offsets = [2, 0], sizes = [1, 256], strides = [1, 1]} : vector<8x256xf32> to vector<1x256xf32>
    %109 = vector.broadcast %107 : vector<16x1xf32> to vector<16x256xf32>
    %110 = vector.broadcast %108 : vector<1x256xf32> to vector<16x256xf32>
    %111 = arith.mulf %109, %110 : vector<16x256xf32>
    %112 = arith.addf %106, %111 : vector<16x256xf32>
    %113 = vector.extract_strided_slice %95 {offsets = [0, 3], sizes = [16, 1], strides = [1, 1]} : vector<16x8xf32> to vector<16x1xf32>
    %114 = vector.extract_strided_slice %94 {offsets = [3, 0], sizes = [1, 256], strides = [1, 1]} : vector<8x256xf32> to vector<1x256xf32>
    %115 = vector.broadcast %113 : vector<16x1xf32> to vector<16x256xf32>
    %116 = vector.broadcast %114 : vector<1x256xf32> to vector<16x256xf32>
    %117 = arith.mulf %115, %116 : vector<16x256xf32>
    %118 = arith.addf %112, %117 : vector<16x256xf32>
    %119 = vector.extract_strided_slice %95 {offsets = [0, 4], sizes = [16, 1], strides = [1, 1]} : vector<16x8xf32> to vector<16x1xf32>
    %120 = vector.extract_strided_slice %94 {offsets = [4, 0], sizes = [1, 256], strides = [1, 1]} : vector<8x256xf32> to vector<1x256xf32>
    %121 = vector.broadcast %119 : vector<16x1xf32> to vector<16x256xf32>
    %122 = vector.broadcast %120 : vector<1x256xf32> to vector<16x256xf32>
    %123 = arith.mulf %121, %122 : vector<16x256xf32>
    %124 = arith.addf %118, %123 : vector<16x256xf32>
    %125 = vector.extract_strided_slice %95 {offsets = [0, 5], sizes = [16, 1], strides = [1, 1]} : vector<16x8xf32> to vector<16x1xf32>
    %126 = vector.extract_strided_slice %94 {offsets = [5, 0], sizes = [1, 256], strides = [1, 1]} : vector<8x256xf32> to vector<1x256xf32>
    %127 = vector.broadcast %125 : vector<16x1xf32> to vector<16x256xf32>
    %128 = vector.broadcast %126 : vector<1x256xf32> to vector<16x256xf32>
    %129 = arith.mulf %127, %128 : vector<16x256xf32>
    %130 = arith.addf %124, %129 : vector<16x256xf32>
    %131 = vector.extract_strided_slice %95 {offsets = [0, 6], sizes = [16, 1], strides = [1, 1]} : vector<16x8xf32> to vector<16x1xf32>
    %132 = vector.extract_strided_slice %94 {offsets = [6, 0], sizes = [1, 256], strides = [1, 1]} : vector<8x256xf32> to vector<1x256xf32>
    %133 = vector.broadcast %131 : vector<16x1xf32> to vector<16x256xf32>
    %134 = vector.broadcast %132 : vector<1x256xf32> to vector<16x256xf32>
    %135 = arith.mulf %133, %134 : vector<16x256xf32>
    %136 = arith.addf %130, %135 : vector<16x256xf32>
    %137 = vector.extract_strided_slice %95 {offsets = [0, 7], sizes = [16, 1], strides = [1, 1]} : vector<16x8xf32> to vector<16x1xf32>
    %138 = vector.extract_strided_slice %94 {offsets = [7, 0], sizes = [1, 256], strides = [1, 1]} : vector<8x256xf32> to vector<1x256xf32>
    %139 = vector.broadcast %137 : vector<16x1xf32> to vector<16x256xf32>
    %140 = vector.broadcast %138 : vector<1x256xf32> to vector<16x256xf32>
    %141 = arith.mulf %139, %140 : vector<16x256xf32>
    %142 = arith.addf %136, %141 : vector<16x256xf32>
    %c0_33 = arith.constant 0 : index
    %c0_34 = arith.constant 0 : index
    %c0_35 = arith.constant 0 : index
    %143 = vector.load %arg5[%c0_33, %c0_34, %c0_35] : memref<1x16x256xf32, #tpu.memory_space<vmem>>, vector<1x16x256xf32>
    %144 = vector.shape_cast %143 : vector<1x16x256xf32> to vector<16x256xf32>
    %145 = vector.shape_cast %142 : vector<16x256xf32> to vector<1x16x256xf32>
    tpu.vector_store %arg5[%c0_33, %c0_34, %c0_35], %145 {strides = array<i32>} : memref<1x16x256xf32, #tpu.memory_space<vmem>>, vector<1x16x256xf32>,
    return
  }
  func.func @transform_0(%arg0: i32) -> (i32, i32, i32) {
    %c0_i32 = arith.constant 0 : i32
    %c0_i32_0 = arith.constant 0 : i32
    %c0_i32_1 = arith.constant 0 : i32
    return %arg0, %c0_i32, %c0_i32_0 : i32, i32, i32
  }
  func.func @transform_1(%arg0: i32) -> (i32, i32) {
    %c0_i32 = arith.constant 0 : i32
    %c0_i32_0 = arith.constant 0 : i32
    %c0_i32_1 = arith.constant 0 : i32
    return %c0_i32, %c0_i32_0 : i32, i32
  }
  func.func @transform_2(%arg0: i32) -> (i32, i32) {
    %c0_i32 = arith.constant 0 : i32
    %c0_i32_0 = arith.constant 0 : i32
    %c0_i32_1 = arith.constant 0 : i32
    return %c0_i32, %c0_i32_0 : i32, i32
  }
  func.func @transform_3(%arg0: i32) -> (i32, i32) {
    %c0_i32 = arith.constant 0 : i32
    %c0_i32_0 = arith.constant 0 : i32
    %c0_i32_1 = arith.constant 0 : i32
    return %c0_i32, %c0_i32_0 : i32, i32
  }
  func.func @transform_4(%arg0: i32) -> (i32, i32, i32) {
    %c0_i32 = arith.constant 0 : i32
    %c0_i32_0 = arith.constant 0 : i32
    %c0_i32_1 = arith.constant 0 : i32
    return %arg0, %c0_i32, %c0_i32_0 : i32, i32, i32
  }
}

</mosaic_0001>

<bundles_post_ra>
// kernel: separable_conv2d_pallas.1
= control target key start
LH: loop header
LB: loop body
LE: loop exit
PB: predicated region body
PF: predicated region fallthrough
CT: control target
= control target key end

     0   :  { %s807_s15 = smov 0   ;;  %s1035_s0 = inlined_call_operand.vmem [shape: f32[2,8,256], index: 0, kind: input, shape index: {}]   ;;  %s1036_s1 = inlined_call_operand.vmem [shape: f32[8,9], index: 1, kind: input, shape index: {}]   ;;  %s1037_s2 = inlined_call_operand.vmem [shape: f32[8,1], index: 2, kind: input, shape index: {}]   ;;  %s1038_s3 = inlined_call_operand.vmem [shape: f32[16,8], index: 3, kind: input, shape index: {}]   ;;  %s1039_s4 = inlined_call_operand.vmem [shape: f32[2,16,256], index: 4, kind: output, shape index: {}]  }
   0x1 LB: > { %s696_s16 = sadd.s32 4294967295, %s762_s15   ;;  %p700_p0 = scmp.ge.s32.totalorder %s762_s15, 1  ;;  %s762_s15 = sphi %s807_s15, %s14_s15  }
   0x2   : > { %p162_p1 = scmp.lt.s32.totalorder %s762_s15, 3 }
   0x4   : > { %p163_p2 = pnand %p700_p0, %p162_p1 }
   0x5   : > { %v204_v0 = vld [vmem:[%s1036_s1] sm:$0xff] (!%p163_p2)  ;;  %p188_p3 = scmp.lt.s32.totalorder (!%p163_p2), %s696_s16, 1  ;;  %v764_v1 = vmov (!%p163_p2), 1   ;;  %v765_v2 = vmov (!%p163_p2), 3   ;;  %v766_v3 = vmov (!%p163_p2), 0.0   ;;  %s767_s20 = smov (!%p163_p2), 17   ;;  %v205_v52 = vlaneseq (!%p163_p2) }
   0x6   : > { %166 = sbr.rel (%p163_p2) target bundleno = 319 (0x13f), region = 36  ;;  %735 = vset.pattern.permute.xlu0 (!%p163_p2), %v764_v1  ;;  %737 = vset.pattern.permute.xlu1 (!%p163_p2), %v765_v2  ;;  %v768_v4 = vmov (!%p163_p2), 7   ;;  %s769_s24 = smov (!%p163_p2), 15   ;;  %v770_v7 = vmov (!%p163_p2), 4   ;;  %v773_v8 = vmov (!%p163_p2), 8   ;;  %v775_v9 = vmov (!%p163_p2), 0  }
   0x7   : > { %271 = vperm.xlu0 (!%p163_p2), %735, %v204_v0   ;;  %250 = vrot.lane.b32.xlu1 (!%p163_p2), %v766_v3, %s767_s20  ;;  %s771_s25 = smov (!%p163_p2), 1   ;;  %s772_s26 = smov (!%p163_p2), 127   ;;  %v435_v10 = vld [vmem:[%s1037_s2] sm:$0xff] (!%p163_p2)  ;;  %v776_v11 = vmov (!%p163_p2), 5   ;;  %v778_v13 = vmov (!%p163_p2), 6   ;;  %v779_v14 = vmov (!%p163_p2), 2  }
   0x8   : > { %s774_s27 = smov (!%p163_p2), 113   ;;  %s777_s30 = smov (!%p163_p2), 111   ;;  %v445_v12 = vld [vmem:[%s1038_s3] sm:$0xff] (!%p163_p2)  ;;  %v446_v15 = vld [vmem:[%s1038_s3 + $0x8] sm:$0xff] (!%p163_p2)  ;;  %vm256_vm0 = vcmask (!%p163_p2), 138240   ;;  %v206_v53 = vand.u32 (!%p163_p2), 127, %v205_v52 }
   0x9   : > { %s780_s9 = smov (!%p163_p2), 16   ;;  %s781_s10 = smov (!%p163_p2), 112   ;;  %vm299_vm3 = vcmask (!%p163_p2), 121856   ;;  %vm320_vm5 = vcmask (!%p163_p2), 7168   ;;  %vm286_vm7 = vcmask (!%p163_p2), 130048   ;;  %vm355_vm8 = vcmask (!%p163_p2), 1039360  }
   0xa   : > { %v207_v56 = vadd.s32 (!%p163_p2), 128, %v206_v53  ;;  %v212_v57 = vand.u32 (!%p163_p2), 15, %v206_v53  ;;  %vm376_vm9 = vcmask (!%p163_p2), 924672   ;;  %vm420_vm10 = vcmask (!%p163_p2), 908288  }
   0xb   : > { %736 = vset.pattern.permute.xlu0 (!%p163_p2), %v768_v4  ;;  %vm407_vm11 = vcmask (!%p163_p2), 916480  }
   0xc   : > { %392 = vperm.xlu0 (!%p163_p2), %736, %v204_v0   ;;  %v219_v58 = vand.u32 (!%p163_p2), 15, %v207_v56  ;;  %vm903_vm1 = vcmp.ge.s32.totalorder (!%p163_p2), %v212_v57, 1  ;;  %vm921_vm6 = vcmp.lt.s32.totalorder (!%p163_p2), %v212_v57, 15 }
   0xd   : > { %s1049_s16 = smov (!%p188_p3, %s696_s16), 1 }
   0xe   : > { %s707_s19 = sshll.u32 %s1049_s16, 4  ;;  %vm907_vm2 = vcmp.ge.s32.totalorder %v219_v58, 1  ;;  %vm911_vm4 = vcmp.lt.s32.totalorder %v219_v58, 15  ;;  %s708_s11 = sshll.u32 %s1049_s16, 5 }
   0xf   : > { %s192_s23 = scalar_lea.vmem %s1035_s0, %s707_s19  ;;  %s1021_s14 = scalar_lea.vmem %s1039_s4, %s708_s11 }
  0x10   : > { %v827_v5 = vld [vmem:[%s192_s23] sm:$0xff]  ;;  %v831_v6 = vld [vmem:[%s192_s23 + $0x8] sm:$0xff]  ;;  %738 = vset.pattern.permute.xlu0 %v770_v7 }
  0x11   : > { %252 = vrot.lane.b32.xlu1 %v827_v5, %s767_s20  ;;  %295 = vrot.lane.b32.xlu0 %v827_v5, %s769_s24 }
  0x15   : > { %254 = vrot.lane.b32.xlu1 %v831_v6, %s767_s20  ;;  %318 = vrot.lane.b32.xlu0 %v831_v6, %s771_s25 }
  0x19   : > { %293 = vrot.lane.b32.xlu1 %v766_v3, %s769_s24  ;;  %336 = vperm.xlu0 %738, %v204_v0  }
  0x1d   : > { %297 = vrot.lane.b32.xlu1 %v831_v6, %s769_s24  ;;  %353 = vrot.lane.b32.xlu0 %v766_v3, %s772_s26 }
  0x1e   : > { %741 = vset.pattern.permute.xlu0 %v773_v8 }
  0x21   : > { %314 = vrot.lane.b32.xlu1 %v766_v3, %s771_s25  ;;  %370 = vrot.lane.b32.xlu0 %v827_v5, %s774_s27 }
  0x25   : > { %316 = vrot.lane.b32.xlu1 %v827_v5, %s771_s25  ;;  %428 = vperm.xlu0 %741, %v204_v0  }
  0x29   : > { %328 = vperm.xlu1 %737, %v204_v0   ;;  %742 = vset.pattern.permute.xlu0 %v775_v9 }
  0x2a   : > { %265 = vperm.xlu0 %742, %v204_v0  }
  0x2d   : > { %349 = vrot.lane.b32.xlu1 %v827_v5, %s772_s26 }
  0x2e   : > { %739 = vset.pattern.permute.xlu1 %v776_v11  ;;  %438 = vperm.xlu0 %742, %v435_v10  }
  0x31   : > { %351 = vrot.lane.b32.xlu1 %v831_v6, %s772_s26 }
  0x32   : > { %418 = vrot.lane.b32.xlu0 %v766_v3, %s777_s30 }
  0x35   : > { %363 = vperm.xlu1 %739, %v204_v0  }
  0x36   : > { %449 = vperm.xlu0 %742, %v445_v12  }
  0x39   : > { %740 = vset.pattern.permute.xlu1 %v778_v13 }
  0x3a   : > { %384 = vperm.xlu1 %740, %v204_v0   ;;  %744 = vset.pattern.permute.xlu0 %v764_v1 }
  0x3b   : > { %470 = vperm.xlu0 %744, %v445_v12  }
  0x3e   : > { %372 = vrot.lane.b32.xlu1 %v831_v6, %s774_s27 }
  0x3f   : > { %743 = vset.pattern.permute.xlu1 %v775_v9  ;;  %745 = vset.pattern.permute.xlu0 %v779_v14 }
  0x40   : > { %307 = vperm.xlu0 %745, %v204_v0  }
  0x42   : > { %374 = vrot.lane.b32.xlu1 %v766_v3, %s774_s27 }
  0x46   : > { %414 = vrot.lane.b32.xlu1 %v827_v5, %s777_s30 }
  0x4a   : > { %416 = vrot.lane.b32.xlu1 %v831_v6, %s777_s30 }
  0x4e   : > { %454 = vperm.xlu1 %743, %v446_v15  }
  0x52   : > { %746 = vset.pattern.permute.xlu1 %v764_v1 }
  0x53   : > { %474 = vperm.xlu1 %746, %v446_v15  }
  0x57   : > { %747 = vset.pattern.permute.xlu1 %v779_v14 }
  0x58   : > { %494 = vperm.xlu1 %747, %v445_v12  }
  0x5c   : > { %748 = vset.pattern.permute.xlu1 %v765_v2 }
  0x79   : > { %v251_v16 = vpop.permute.xlu1 %250 }
  0x83   : > { %v253_v17 = vpop.permute.xlu1 %252 }
  0x84   : > { %v856_v18 = vsel %vm256_vm0, %v251_v16, %v253_v17 }
  0x85   : > { %v261_v3 = vsel %vm903_vm1, %v856_v18, 0.0 }
  0x86   : > { %v272_v21 = vpop.permute.xlu0 %271 }
  0x87   : > { %v255_v19 = vpop.permute.xlu1 %254  ;;  %v274_v22 = vmul.f32 0.0, %v272_v21  ;;  %v276_v23 = vmul.f32 %v272_v21, %v831_v6  ;;  %v275_v24 = vmul.f32 %v272_v21, %v827_v5 }
  0x88   : > { %v858_v20 = vsel %vm256_vm0, %v253_v17, %v255_v19 }
  0x89   : > { %284 = vrot.lane.b32.xlu0 %v276_v23, %s780_s9  ;;  %280 = vrot.lane.b32.xlu1 %v274_v22, %s780_s9 }
  0x8b   : > { %v393_v25 = vpop.permute.xlu0 %392  ;;  %v294_v29 = vpop.permute.xlu1 %293 }
  0x8c   : > { %v396_v26 = vmul.f32 %v393_v25, %v831_v6  ;;  %v395_v27 = vmul.f32 %v393_v25, %v827_v5  ;;  %v397_v28 = vmul.f32 0.0, %v393_v25 }
  0x8d   : > { %498 = vperm.xlu0 %745, %v446_v15   ;;  %282 = vrot.lane.b32.xlu1 %v275_v24, %s780_s9 }
  0x8f   : > { %v298_v30 = vpop.permute.xlu1 %297  ;;  %v296_v34 = vpop.permute.xlu0 %295 }
  0x90   : > { %v301_v63 = vsel %vm299_vm3, %v296_v34, %v298_v30 }
  0x91   : > { %518 = vperm.xlu1 %748, %v445_v12   ;;  %403 = vrot.lane.b32.xlu0 %v396_v26, %s781_s10  ;;  %v305_v10 = vsel %vm911_vm4, %v301_v63, 0.0 }
  0x92   : > { %749 = vset.pattern.permute.xlu0 %v770_v7 }
  0x93   : > { %v867_v31 = vpop.permute.xlu1 %314  ;;  %v319_v36 = vpop.permute.xlu0 %318 }
  0x95   : > { %522 = vperm.xlu1 %748, %v446_v15   ;;  %542 = vperm.xlu0 %749, %v445_v12  }
  0x97   : > { %v317_v32 = vpop.permute.xlu1 %316 }
  0x98   : > { %v872_v38 = vpop.permute.xlu0 %336  ;;  %v322_v9 = vsel %vm320_vm5, %v317_v32, %v319_v36  ;;  %v321_v26 = vsel %vm320_vm5, %v867_v31, %v317_v32 }
  0x99   : > { %401 = vrot.lane.b32.xlu1 %v395_v27, %s781_s10  ;;  %752 = vset.pattern.permute.xlu0 %v776_v11  ;;  %v326_v16 = vsel %vm907_vm2, %v322_v9, 0.0  ;;  %v339_v36 = vmul.f32 %v872_v38, %v827_v5  ;;  %v970_v9 = vshrl.u32 %v205_v52, 7 }
  0x9a   : > { %750 = vset.pattern.permute.xlu1 %v770_v7  ;;  %570 = vperm.xlu0 %752, %v446_v15   ;;  %v300_v7 = vsel %vm299_vm3, %v294_v29, %v296_v34 }
  0x9b   : > { %v503_v52 = vsub.s32 2, %v970_v9 }
  0x9c   : > { %v876_v40 = vpop.permute.xlu0 %353 }
  0x9d   : > { %546 = vperm.xlu1 %750, %v446_v15  }
  0x9e   : > { %754 = vset.pattern.permute.xlu0 %v768_v4 }
  0x9f   : > { %614 = vperm.xlu0 %754, %v445_v12  }
  0xa0   : > { %v371_v42 = vpop.permute.xlu0 %370 }
  0xa1   : > { %405 = vrot.lane.b32.xlu1 %v397_v28, %s781_s10  ;;  %v325_v28 = vsel %vm903_vm1, %v321_v26, 0.0 }
  0xa2   : > { %751 = vset.pattern.permute.xlu1 %v776_v11 }
  0xa4   : > { %v882_v44 = vpop.permute.xlu0 %428 }
  0xa5   : > { %566 = vperm.xlu1 %751, %v445_v12  }
  0xa8   : > { %v329_v33 = vpop.permute.xlu1 %328 }
  0xa9   : > { %753 = vset.pattern.permute.xlu1 %v778_v13  ;;  %v266_v46 = vpop.permute.xlu0 %265  ;;  %v332_v23 = vmul.f32 %v329_v33, %v326_v16  ;;  %v331_v29 = vmul.f32 %v329_v33, %v325_v28  ;;  %v527_v16 = vsub.s32 3, %v970_v9 }
  0xaa   : > { %590 = vperm.xlu1 %753, %v445_v12   ;;  %v268_v11 = vmul.f32 %v266_v46, %v261_v3 }
  0xac   : > { %v350_v35 = vpop.permute.xlu1 %349 }
  0xad   : > { %v886_v48 = vpop.permute.xlu0 %438 }
  0xae   : > { %594 = vperm.xlu1 %753, %v446_v15  }
  0xb0   : > { %v870_v37 = vpop.permute.xlu1 %351 }
  0xb1   : > { %v890_v50 = vpop.permute.xlu0 %418  ;;  %v356_v30 = vsel %vm355_vm8, %v350_v35, %v870_v37 }
  0xb2   : > { %755 = vset.pattern.permute.xlu1 %v768_v4  ;;  %v262_v4 = vsel %vm907_vm2, %v858_v20, 0.0 }
  0xb3   : > { %618 = vperm.xlu1 %755, %v446_v15   ;;  %v269_v12 = vmul.f32 %v266_v46, %v262_v4  ;;  %v304_v15 = vsel %vm921_vm6, %v300_v7, 0.0  ;;  %v360_v46 = vsel %vm921_vm6, %v356_v30, 0.0 }
  0xb4   : > { %v874_v39 = vpop.permute.xlu1 %363 }
  0xb5   : > { %v895_v54 = vpop.permute.xlu0 %449  ;;  %v366_v33 = vmul.f32 %v874_v39, %v360_v46 }
  0xb9   : > { %v878_v41 = vpop.permute.xlu1 %384 }
  0xba   : > { %v899_v59 = vpop.permute.xlu0 %470 }
  0xbd   : > { %v880_v43 = vpop.permute.xlu1 %372 }
  0xbe   : > { %v377_v31 = vsel %vm376_vm9, %v371_v42, %v880_v43  ;;  %v357_v42 = vsel %vm355_vm8, %v870_v37, %v876_v40 }
  0xbf   : > { %v308_v1 = vpop.permute.xlu0 %307  ;;  %v381_v35 = vsel %vm903_vm1, %v377_v31, 0.0 }
  0xc0   : > { %v310_v19 = vmul.f32 %v308_v1, %v304_v15  ;;  %v311_v20 = vmul.f32 %v308_v1, %v305_v10  ;;  %v387_v63 = vmul.f32 %v878_v41, %v381_v35  ;;  %v340_v1 = vmul.f32 %v872_v38, %v831_v6 }
  0xc1   : > { %v884_v45 = vpop.permute.xlu1 %374 }
  0xc2   : > { %v378_v7 = vsel %vm376_vm9, %v880_v43, %v884_v45  ;;  %v459_v45 = vsub.s32 0, %v970_v9 }
  0xc3   : > { %v382_v10 = vsel %vm907_vm2, %v378_v7, 0.0 }
  0xc4   : > { %v388_v15 = vmul.f32 %v878_v41, %v382_v10 }
  0xc5   : > { %v415_v47 = vpop.permute.xlu1 %414 }
  0xc9   : > { %v888_v49 = vpop.permute.xlu1 %416 }
  0xca   : > { %v421_v5 = vsel %vm420_vm10, %v415_v47, %v888_v49 }
  0xcb   : > { %v425_v61 = vsel %vm921_vm6, %v421_v5, 0.0 }
  0xcc   : > { %v431_v6 = vmul.f32 %v882_v44, %v425_v61 }
  0xcd   : > { %v892_v51 = vpop.permute.xlu1 %454 }
  0xd2   : > { %v897_v55 = vpop.permute.xlu1 %474 }
  0xd7   : > { %v901_v60 = vpop.permute.xlu1 %494 }
  0xfb   : > { %v281_v2 = vpop.permute.xlu1 %280  ;;  %v285_v13 = vpop.permute.xlu0 %284 }
  0xff   : > { %v283_v14 = vpop.permute.xlu1 %282 }
 0x100   : > { %v287_v17 = vsel %vm286_vm7, %v281_v2, %v283_v14  ;;  %v288_v18 = vsel %vm286_vm7, %v283_v14, %v285_v13  ;;  %v361_v2 = vsel %vm911_vm4, %v357_v42, 0.0  ;;  %v479_v14 = vsub.s32 1, %v970_v9 }
 0x101   : > { %v291_v21 = vadd.f32 %v287_v17, %v268_v11  ;;  %v292_v22 = vadd.f32 %v288_v18, %v269_v12  ;;  %v367_v8 = vmul.f32 %v874_v39, %v361_v2  ;;  %v422_v39 = vsel %vm420_vm10, %v888_v49, %v890_v50 }
 0x102   : > { %v623_v2 = vsub.s32 7, %v970_v9 }
 0x103   : > { %v312_v24 = vadd.f32 %v310_v19, %v291_v21  ;;  %v313_v25 = vadd.f32 %v311_v20, %v292_v22  ;;  %v426_v20 = vsel %vm911_vm4, %v422_v39, 0.0 }
 0x104   : > { %v432_v28 = vmul.f32 %v882_v44, %v426_v20 }
 0x105   : > { %v334_v27 = vadd.f32 %v332_v23, %v313_v25  ;;  %v333_v34 = vadd.f32 %v331_v29, %v312_v24  ;;  %v551_v24 = vsub.s32 4, %v970_v9 }
 0x107   : > { %v341_v53 = vadd.f32 %v339_v36, %v333_v34  ;;  %v342_v40 = vadd.f32 %v340_v1, %v334_v27  ;;  %v575_v36 = vsub.s32 5, %v970_v9 }
 0x109   : > { %v368_v58 = vadd.f32 %v366_v33, %v341_v53  ;;  %v369_v13 = vadd.f32 %v367_v8, %v342_v40 }
 0x10b   : > { %v389_v3 = vadd.f32 %v387_v63, %v368_v58  ;;  %v390_v18 = vadd.f32 %v388_v15, %v369_v13 }
 0x10c   : > { %v947_v56 = vpop.permute.xlu0 %498 }
 0x110   : > { %v944_v32 = vpop.permute.xlu1 %518  ;;  %v404_v47 = vpop.permute.xlu0 %403 }
 0x114   : > { %v953_v57 = vpop.permute.xlu1 %522  ;;  %v991_v41 = vpop.permute.xlu0 %542 }
 0x118   : > { %v402_v4 = vpop.permute.xlu1 %401 }
 0x119   : > { %v408_v37 = vsel %vm407_vm11, %v402_v4, %v404_v47  ;;  %v571_v42 = vpop.permute.xlu0 %570 }
 0x11a   : > { %v412_v38 = vadd.f32 %v408_v37, %v389_v3 }
 0x11c   : > { %v433_v11 = vadd.f32 %v431_v6, %v412_v38  ;;  %v976_v12 = vpop.permute.xlu1 %546 }
 0x11e   : > { %v441_v43 = vadd.f32 %v886_v48, %v433_v11  ;;  %v615_v15 = vpop.permute.xlu0 %614 }
 0x120   : > { %v443_v62 = vmax.f32 %v441_v43, 0.0  ;;  %v406_v17 = vpop.permute.xlu1 %405 }
 0x121   : > { %v409_v19 = vsel %vm407_vm11, %v404_v47, %v406_v17  ;;  %v599_v47 = vsub.s32 6, %v970_v9 }
 0x122   : > { %v460_v21 = vrot.slane %v443_v62, %v459_v45  ;;  %v480_v22 = vrot.slane %v443_v62, %v479_v14  ;;  %v504_v23 = vrot.slane %v443_v62, %v503_v52  ;;  %v413_v25 = vadd.f32 %v409_v19, %v390_v18 }
 0x123   : > { %v528_v26 = vrot.slane %v443_v62, %v527_v16  ;;  %v552_v46 = vrot.slane %v443_v62, %v551_v24  ;;  %v576_v7 = vrot.slane %v443_v62, %v575_v36  ;;  %v600_v43 = vrot.slane %v443_v62, %v599_v47 }
 0x124   : > { %v465_v49 = vmul.f32 %v460_v21, %v895_v54  ;;  %v485_v50 = vmul.f32 %v480_v22, %v899_v59  ;;  %v995_v27 = vpop.permute.xlu1 %566  ;;  %v467_v0 = vmul.f32 %v460_v21, %v892_v51  ;;  %v487_v29 = vmul.f32 %v480_v22, %v897_v55 }
 0x125   : > { %v509_v34 = vmul.f32 %v504_v23, %v901_v60  ;;  %v511_v53 = vmul.f32 %v504_v23, %v947_v56  ;;  %v434_v33 = vadd.f32 %v432_v28, %v413_v25  ;;  %v533_v5 = vmul.f32 %v528_v26, %v944_v32 }
 0x126   : > { %v489_v30 = vadd.f32 %v485_v50, %v465_v49  ;;  %v491_v31 = vadd.f32 %v487_v29, %v467_v0  ;;  %v535_v44 = vmul.f32 %v528_v26, %v953_v57  ;;  %v557_v3 = vmul.f32 %v552_v46, %v991_v41 }
 0x127   : > { %v442_v63 = vadd.f32 %v886_v48, %v434_v33  ;;  %v559_v40 = vmul.f32 %v552_v46, %v976_v12  ;;  %v624_v48 = vrot.slane %v443_v62, %v623_v2  ;;  %v581_v18 = vmul.f32 %v576_v7, %v995_v27 }
 0x128   : > { %v513_v35 = vadd.f32 %v509_v34, %v489_v30  ;;  %v515_v58 = vadd.f32 %v511_v53, %v491_v31  ;;  %v583_v19 = vmul.f32 %v576_v7, %v571_v42 }
 0x129   : > { %v591_v1 = vpop.permute.xlu1 %590  ;;  %v444_v37 = vmax.f32 %v442_v63, 0.0  ;;  %v629_v25 = vmul.f32 %v624_v48, %v615_v15 }
 0x12a   : > { %v537_v61 = vadd.f32 %v533_v5, %v513_v35  ;;  %v539_v4 = vadd.f32 %v535_v44, %v515_v58  ;;  %v605_v20 = vmul.f32 %v600_v43, %v591_v1 }
 0x12b   : > { %v464_v38 = vrot.slane %v444_v37, %v459_v45  ;;  %v484_v8 = vrot.slane %v444_v37, %v479_v14  ;;  %v508_v13 = vrot.slane %v444_v37, %v503_v52  ;;  %v532_v17 = vrot.slane %v444_v37, %v527_v16 }
 0x12c   : > { %v561_v6 = vadd.f32 %v557_v3, %v537_v61  ;;  %v563_v11 = vadd.f32 %v559_v40, %v539_v4  ;;  %v556_v14 = vrot.slane %v444_v37, %v551_v24  ;;  %v580_v16 = vrot.slane %v444_v37, %v575_v36 }
 0x12d   : > { %v595_v10 = vpop.permute.xlu1 %594  ;;  %v466_v39 = vmul.f32 %v464_v38, %v895_v54  ;;  %v486_v9 = vmul.f32 %v484_v8, %v899_v59  ;;  %v510_v45 = vmul.f32 %v508_v13, %v901_v60  ;;  %v468_v52 = vmul.f32 %v464_v38, %v892_v51 }
 0x12e   : > { %v585_v22 = vadd.f32 %v581_v18, %v561_v6  ;;  %v587_v23 = vadd.f32 %v583_v19, %v563_v11  ;;  %v488_v62 = vmul.f32 %v484_v8, %v897_v55  ;;  %v534_v59 = vmul.f32 %v532_v17, %v944_v32 }
 0x12f   : > { %v490_v21 = vadd.f32 %v486_v9, %v466_v39  ;;  %v512_v24 = vmul.f32 %v508_v13, %v947_v56  ;;  %v607_v26 = vmul.f32 %v600_v43, %v595_v10  ;;  %v558_v55 = vmul.f32 %v556_v14, %v991_v41 }
 0x130   : > { %v609_v50 = vadd.f32 %v605_v20, %v585_v22  ;;  %v492_v60 = vadd.f32 %v488_v62, %v468_v52  ;;  %v604_v0 = vrot.slane %v444_v37, %v599_v47  ;;  %v536_v30 = vmul.f32 %v532_v17, %v953_v57 }
 0x131   : > { %v514_v49 = vadd.f32 %v510_v45, %v490_v21  ;;  %v611_v34 = vadd.f32 %v607_v26, %v587_v23  ;;  %v628_v36 = vrot.slane %v444_v37, %v623_v2  ;;  %v582_v31 = vmul.f32 %v580_v16, %v995_v27 }
 0x132   : > { %v619_v54 = vpop.permute.xlu1 %618  ;;  %v633_v29 = vadd.f32 %v629_v25, %v609_v50  ;;  %v516_v32 = vadd.f32 %v512_v24, %v492_v60  ;;  %v560_v56 = vmul.f32 %v556_v14, %v976_v12  ;;  %v606_v41 = vmul.f32 %v604_v0, %v591_v1 }
 0x133   : > { %v631_v28 = vmul.f32 %v624_v48, %v619_v54  ;;  %v538_v51 = vadd.f32 %v534_v59, %v514_v49  ;;  %v584_v5 = vmul.f32 %v580_v16, %v571_v42  ;;  %v630_v44 = vmul.f32 %v628_v36, %v615_v15 }
 0x134   : > { %637 = vst [vmem:[%s1021_s14] sm:$0xff] %v633_v29  ;;  %v540_v53 = vadd.f32 %v536_v30, %v516_v32  ;;  %v608_v61 = vmul.f32 %v604_v0, %v595_v10  ;;  %v632_v3 = vmul.f32 %v628_v36, %v619_v54 }
 0x135   : > { %v562_v46 = vadd.f32 %v558_v55, %v538_v51  ;;  %v635_v33 = vadd.f32 %v631_v28, %v611_v34 }
 0x136   : > { %v564_v58 = vadd.f32 %v560_v56, %v540_v53 }
 0x137   : > { %v586_v35 = vadd.f32 %v582_v31, %v562_v46  ;;  %639 = vst [vmem:[%s1021_s14 + $0x10] sm:$0xff] %v635_v33 }
 0x138   : > { %v588_v57 = vadd.f32 %v584_v5, %v564_v58 }
 0x139   : > { %v610_v63 = vadd.f32 %v606_v41, %v586_v35 }
 0x13a   : > { %v612_v47 = vadd.f32 %v608_v61, %v588_v57 }
 0x13b   : > { %v634_v2 = vadd.f32 %v630_v44, %v610_v63 }
 0x13c   : > { %v636_v27 = vadd.f32 %v632_v3, %v612_v47 }
 0x13d   : > { %638 = vst [vmem:[%s1021_s14 + $0x8] sm:$0xff] %v634_v2 }
 0x13e   : > { %640 = vst [vmem:[%s1021_s14 + $0x18] sm:$0xff] %v636_v27 }
 0x13f PF: > { %s14_s15 = sadd.s32 1, %s762_s15  }
 0x140   : > { %p11_p4 = scmp.ge.s32.totalorder %s14_s15, 4  }
 0x142   :  { %13 = sbr.rel (!%p11_p4) target bundleno = 1 (0x1), region = 66 }

</bundles_post_ra>
